<compile_context>
chip_gen: v7x
topology: tpu7x:2x2x1
jax: 0.10.0
libtpu: 0.0.40
codegen_flags: <defaults>
</compile_context>

<pallas_src>
import jax
import jax.numpy as jnp
from jax import lax
from jax.experimental import pallas as pl
from jax.experimental.pallas import tpu as pltpu


def _round_up(x, m):
    return ((x + m - 1) // m) * m


def _linear_kernel(x_ref, w_ref, b_ref, o_ref, acc_ref):
    # x_ref: (tm, tk)   w_ref: (tn, tk)   b_ref: (1, tn)
    # o_ref: (tm, tn)   acc_ref: (tm, tn) f32 scratch, resident across K axis
    k = pl.program_id(2)

    @pl.when(k == 0)
    def _():
        acc_ref[...] = jnp.zeros_like(acc_ref)

    # Contract K of both operands (weight kept as (N, K)); MXU handles the
    # transposed RHS natively -- no transpose op in the kernel or the wrapper.
    acc_ref[...] += lax.dot_general(
        x_ref[...], w_ref[...],
        dimension_numbers=(((1,), (1,)), ((), ())),
        preferred_element_type=jnp.float32)

    @pl.when(k == pl.num_programs(2) - 1)
    def _():
        o_ref[...] = (acc_ref[...] + b_ref[...]).astype(o_ref.dtype)


def dynamic_linear_forward(x, weight, bias, *, tm=None, tn=128, tk=512):
    """x: (B, C, H, W); weight: (num_classes, in_planes); bias: (num_classes,)."""
    B = x.shape[0]
    x_flat = x.reshape(B, -1)                 # glue: flatten (view)
    K = x_flat.shape[1]
    N = weight.shape[0]
    itemsize = jnp.dtype(x.dtype).itemsize

    # ---- generation-friendly, 128-aligned tiles -------------------------
    if tm is None:
        tm = 128 if B >= 128 else _round_up(B, 8)   # sublane-aligned M tile
    tn = min(tn, _round_up(N, 128))                 # lane-dense N tile
    tk = min(tk, _round_up(K, 128))                 # big K tile (BW-bound layer)

    M_pad = _round_up(B, tm)
    N_pad = _round_up(N, tn)
    K_pad = _round_up(K, tk)

    # ---- zero-pad to tile multiples (padded K/N contribute 0, sliced off) --
    x_p = x_flat
    if (M_pad, K_pad) != (B, K):
        x_p = jnp.pad(x_flat, ((0, M_pad - B), (0, K_pad - K)))
    w_p = weight
    if (N_pad, K_pad) != (N, K):
        w_p = jnp.pad(weight, ((0, N_pad - N), (0, K_pad - K)))
    b_p = bias if N_pad == N else jnp.pad(bias, (0, N_pad - N))
    b2d = b_p.reshape(1, N_pad)

    grid = (M_pad // tm, N_pad // tn, K_pad // tk)

    # ---- VMEM budget: 2 buffers per pipelined input/output + f32 acc -------
    vmem_bytes = (2 * tm * tk + 2 * tn * tk + 2 * tn + 2 * tm * tn) * itemsize \
                 + tm * tn * 4 + (1 << 20)
    vmem_bytes = int(min(max(vmem_bytes, 4 << 20), 64 << 20))

    cost = pl.CostEstimate(
        flops=2 * M_pad * K_pad * N_pad,
        transcendentals=0,
        bytes_accessed=itemsize * (M_pad * K_pad + N_pad * K_pad
                                   + M_pad * N_pad + N_pad))

    out = pl.pallas_call(
        _linear_kernel,
        out_shape=jax.ShapeDtypeStruct((M_pad, N_pad), x.dtype),
        grid_spec=pltpu.PrefetchScalarGridSpec(
            num_scalar_prefetch=0,
            grid=grid,
            in_specs=[
                pl.BlockSpec((tm, tk), lambda i, j, k: (i, k)),   # activations
                pl.BlockSpec((tn, tk), lambda i, j, k: (j, k)),   # weight (N,K)
                pl.BlockSpec((1, tn), lambda i, j, k: (0, j)),    # bias, j-only
            ],
            out_specs=pl.BlockSpec((tm, tn), lambda i, j, k: (i, j)),
            scratch_shapes=[pltpu.VMEM((tm, tn), jnp.float32)],
        ),
        compiler_params=pltpu.CompilerParams(
            dimension_semantics=("parallel", "parallel", "arbitrary"),
            vmem_limit_bytes=vmem_bytes),
        cost_estimate=cost,
    )(x_p, w_p, b2d)

    return out[:B, :N]                         # glue: drop M/N padding


def init_params(key, in_planes, num_classes):
    """Deterministic init mimicking nn.Linear defaults (uniform +/- 1/sqrt(in_planes))."""
    kw, kb = jax.random.split(key)
    bound = 1.0 / jnp.sqrt(jnp.float32(in_planes))
    weight = jax.random.uniform(kw, (num_classes, in_planes), jnp.float32,
                                minval=-bound, maxval=bound)
    bias = jax.random.uniform(kb, (num_classes,), jnp.float32,
                              minval=-bound, maxval=bound)
    return weight, bias


if __name__ == "__main__":
    key = jax.random.PRNGKey(0)
    kx, kp = jax.random.split(key)

    B, C, H, W = 2, 4, 16, 16          # in_planes = 4*16*16 = 1024
    num_classes = 10

    x = jax.random.normal(kx, (B, C, H, W), jnp.float32)
    weight, bias = init_params(kp, C * H * W, num_classes)

    out = dynamic_linear_forward(x, weight, bias)
    out = jax.block_until_ready(out)

    # reference check in plain JAX
    ref = x.reshape(B, -1) @ weight.T + bias
    assert out.shape == (B, num_classes)
    assert jnp.allclose(out, ref, atol=1e-4, rtol=1e-4)

    print("KERNEL_OK")
</pallas_src>

<mosaic_0001>
module attributes {stable_mosaic.version = 11 : i64} {
  func.func @_linear_kernel(%arg0: i32, %arg1: i32, %arg2: i32, %arg3: memref<8x512xf32, #tpu.memory_space<vmem>>, %arg4: memref<128x512xf32, #tpu.memory_space<vmem>>, %arg5: memref<1x128xf32, #tpu.memory_space<vmem>>, %arg6: memref<8x128xf32, #tpu.memory_space<vmem>>, %arg7: memref<8x128xf32, #tpu.memory_space<vmem>>) attributes {dimension_semantics = [#tpu.dimension_semantics<parallel>, #tpu.dimension_semantics<parallel>, #tpu.dimension_semantics<arbitrary>], iteration_bounds = array<i64: 1, 1, 2>, scalar_prefetch = 0 : i64, scratch_operands = 1 : i64, tpu.core_type = #tpu.core_type<tc>, window_params = [{transform_indices = @transform_0, window_bounds = array<i64: 8, 512>}, {transform_indices = @transform_1, window_bounds = array<i64: 128, 512>}, {transform_indices = @transform_2, window_bounds = array<i64: 1, 128>}, {transform_indices = @transform_3, window_bounds = array<i64: 8, 128>}]} {
    %c0_i32 = arith.constant 0 : i32
    %0 = arith.cmpi eq, %arg2, %c0_i32 : i32
    %1 = arith.extui %0 : i1 to i32
    %c0_i32_0 = arith.constant 0 : i32
    %2 = arith.cmpi ne, %1, %c0_i32_0 : i32
    scf.if %2 {
      %cst_9 = arith.constant 0.000000e+00 : f32
      %12 = vector.broadcast %cst_9 : f32 to vector<8x128xf32>
      %c0_10 = arith.constant 0 : index
      %c0_11 = arith.constant 0 : index
      %13 = vector.load %arg7[%c0_10, %c0_11] : memref<8x128xf32, #tpu.memory_space<vmem>>, vector<8x128xf32>
      tpu.vector_store %arg7[%c0_10, %c0_11], %12 {strides = array<i32>} : memref<8x128xf32, #tpu.memory_space<vmem>>, vector<8x128xf32>,
    } else {
    }
    %c0 = arith.constant 0 : index
    %c0_1 = arith.constant 0 : index
    %3 = vector.load %arg7[%c0, %c0_1] : memref<8x128xf32, #tpu.memory_space<vmem>>, vector<8x128xf32>
    %c0_2 = arith.constant 0 : index
    %c0_3 = arith.constant 0 : index
    %4 = vector.load %arg3[%c0_2, %c0_3] : memref<8x512xf32, #tpu.memory_space<vmem>>, vector<8x512xf32>
    %c0_4 = arith.constant 0 : index
    %c0_5 = arith.constant 0 : index
    %5 = vector.load %arg4[%c0_4, %c0_5] : memref<128x512xf32, #tpu.memory_space<vmem>>, vector<128x512xf32>
    %cst = arith.constant dense<0.000000e+00> : vector<8x128xf32>
    %6 = tpu.matmul %4, %5, %cst {dimension_numbers = #tpu.dot_dimension_numbers<[1], [1], [0], [0], [0, 0, 1, 0], [], []>} : vector<8x512xf32>, vector<128x512xf32>, vector<8x128xf32> -> vector<8x128xf32>
    %7 = arith.addf %3, %6 : vector<8x128xf32>
    %c0_6 = arith.constant 0 : index
    %c0_7 = arith.constant 0 : index
    %8 = vector.load %arg7[%c0_6, %c0_7] : memref<8x128xf32, #tpu.memory_space<vmem>>, vector<8x128xf32>
    tpu.vector_store %arg7[%c0_6, %c0_7], %7 {strides = array<i32>} : memref<8x128xf32, #tpu.memory_space<vmem>>, vector<8x128xf32>,
    %c1_i32 = arith.constant 1 : i32
    %9 = arith.cmpi eq, %arg2, %c1_i32 : i32
    %10 = arith.extui %9 : i1 to i32
    %c0_i32_8 = arith.constant 0 : i32
    %11 = arith.cmpi ne, %10, %c0_i32_8 : i32
    scf.if %11 {
      %c0_9 = arith.constant 0 : index
      %c0_10 = arith.constant 0 : index
      %12 = vector.load %arg7[%c0_9, %c0_10] : memref<8x128xf32, #tpu.memory_space<vmem>>, vector<8x128xf32>
      %c0_11 = arith.constant 0 : index
      %c0_12 = arith.constant 0 : index
      %13 = vector.load %arg5[%c0_11, %c0_12] : memref<1x128xf32, #tpu.memory_space<vmem>>, vector<1x128xf32>
      %14 = vector.broadcast %13 : vector<1x128xf32> to vector<8x128xf32>
      %15 = arith.addf %12, %14 : vector<8x128xf32>
      %c0_13 = arith.constant 0 : index
      %c0_14 = arith.constant 0 : index
      %16 = vector.load %arg6[%c0_13, %c0_14] : memref<8x128xf32, #tpu.memory_space<vmem>>, vector<8x128xf32>
      tpu.vector_store %arg6[%c0_13, %c0_14], %15 {strides = array<i32>} : memref<8x128xf32, #tpu.memory_space<vmem>>, vector<8x128xf32>,
    } else {
    }
    return
  }
  func.func @transform_0(%arg0: i32, %arg1: i32, %arg2: i32) -> (i32, i32) {
    %c0_i32 = arith.constant 0 : i32
    return %arg0, %arg2 : i32, i32
  }
  func.func @transform_1(%arg0: i32, %arg1: i32, %arg2: i32) -> (i32, i32) {
    %c0_i32 = arith.constant 0 : i32
    return %arg1, %arg2 : i32, i32
  }
  func.func @transform_2(%arg0: i32, %arg1: i32, %arg2: i32) -> (i32, i32) {
    %c0_i32 = arith.constant 0 : i32
    %c0_i32_0 = arith.constant 0 : i32
    return %c0_i32, %arg1 : i32, i32
  }
  func.func @transform_3(%arg0: i32, %arg1: i32, %arg2: i32) -> (i32, i32) {
    %c0_i32 = arith.constant 0 : i32
    return %arg0, %arg1 : i32, i32
  }
}

</mosaic_0001>

<bundles_post_ra>
// kernel: tpu_custom_call.1
= control target key start
LH: loop header
LB: loop body
LE: loop exit
PB: predicated region body
PF: predicated region fallthrough
CT: control target
= control target key end

     0   :  { %8 = vsyncpa [#allocation4], 0  ;;  %s1220_s0 = inlined_call_operand.hbm [shape: f32[8,1024], index: 0, kind: input, shape index: {}]   ;;  %s1221_s1 = inlined_call_operand.hbm [shape: f32[128,1024], index: 1, kind: input, shape index: {}]   ;;  %s1222_s2 = inlined_call_operand.vmem [shape: f32[1,128], index: 2, kind: input, shape index: {}]   ;;  %s1223_s3 = inlined_call_operand.hbm [shape: f32[8,128], index: 3, kind: output, shape index: {}]  }
   0x1   :  { %10 = vsyncpa [#allocation4 + $0x1], 0 }
   0x2   :  { %11 = vsyncpa [#allocation7], 0 }
   0x3   :  { %13 = vsyncpa [#allocation7 + $0x1], 0 }
   0x4   :  { %14 = vsyncpa [#allocation5], 0  ;;  %s943_s12 = smov 0   ;;  %s945_s13 = smov 0  }
   0x5   :  { %s947_s14 = smov 0   ;;  %s949_s15 = smov 0  }
   0x6   :  { %s951_s16 = smov 0   ;;  %s953_s17 = smov 0  }
   0x7 LB: > { %s613_s18 = sadd.s32 4294967295, %s914_s17   ;;  %s32_s19 = sadd.s32 1, %s910_s16  ;;  %s914_s17 = sphi %s953_s17, %s20_s17   ;;  %s910_s16 = sphi %s951_s16, %s1235_s16   ;;  %s906_s15 = sphi %s949_s15, %s1234_s15   ;;  %s902_s14 = sphi %s947_s14, %s1233_s14   ;;  %s898_s13 = sphi %s945_s13, %s1232_s13   ;;  %s894_s12 = sphi %s943_s12, %s1231_s12  }
   0x8   : > { %p33_p0 = scmp.ge.s32.totalorder %s32_s19, 2  ;;  %s48_s20 = sadd.s32 1, %s902_s14 }
   0x9   : > { %p55_p1 = scmp.ne.s32.totalorder %s902_s14, %s898_s13  ;;  %p56_p2 = scmp.eq.s32.totalorder %s914_s17, 0 }
   0xa   : > { %s1237_s19 = smov (%p33_p0, %s32_s19), 0  ;;  %p61_p4 = scmp.ne.s32.totalorder %s898_s13, %s894_s12 }
   0xb   : > { %p979_p3 = por %p56_p2, %p55_p1  ;;  %s44_s22 = ssub.s32 %s910_s16, %s1237_s19 }
   0xc   : > { %p62_p5 = scmp.eq.s32.totalorder %s613_s18, 0  ;;  %p46_p6 = scmp.eq.s32.totalorder %s44_s22, 0 }
   0xd   : > { %p714_p8 = scmp.lt.s32.totalorder %s914_s17, 2  ;;  %s997_s25 = sand.u32 1, %s902_s14  }
   0xe   : > { %p988_p7 = por %p62_p5, %p61_p4  ;;  %s633_s26 = sshll.u32 %s910_s16, 9 }
   0xf   : > { %s994_s24 = scalar_select %p46_p6, %s902_s14, %s48_s20  }
  0x10   : > { %s1226_s23 = scalar_select %p988_p7, 1, 0 }
  0x11   : > { %s617_s27 = sshll.u32 %s997_s25, 5  ;;  %s1006_s30 = scalar_lea.hbm %s1220_s0, %s633_s26 }
  0x12   : > { %s177_s4 = scalar_lea.vmem [#allocation3], %s617_s27  ;;  %p1010_p9 = pnand %p714_p8, %p979_p3 }
  0x13   : > { %s187_s5 = sshll.u32 %s177_s4, 4  ;;  %s620_s7 = sshll.u32 %s997_s25, 9  ;;  %s1014_s5 = int_to_ptr.vmem [resolvable:$true] %s187_s5 }
  0x14   : > { %s174_s8 = scalar_lea.sflag [#allocation4], %s997_s25  ;;  %s770_s9 = scalar_lea.hbm %s1006_s30, 512 }
  0x15   : > { %p771_p10 = scmp.ne.s32.totalorder %s1006_s30, %s770_s9  ;;  %p772_p11 = pneg %p1010_p9 }
  0x16   : > { %s775_s12 = scalar_lea.hbm %s1220_s0, 1024  ;;  %p776_p0 = scmp.lt.u32.totalorder %s1006_s30, %s1220_s0 }
  0x17   : > { %p773_p12 = pnand %p772_p11, %p771_p10  ;;  %p777_p1 = scmp.lt.u32.totalorder %s775_s12, %s770_s9 }
  0x18   : > { %p779_p3 = scmp.lt.u32.totalorder %s770_s9, %s1006_s30 }
  0x19   : > { %p774_p13 = pneg %p773_p12  ;;  %p778_p2 = por %p777_p1, %p776_p0 }
  0x1b   : > { %p780_p4 = por %p779_p3, %p778_p2 }
  0x1d   : > { %p781_p5 = pnand %p780_p4, %p774_p13 }
  0x1f   : > { %784 = shalt.err (!%p781_p5)
}
  0x20   : > { %s785_s22 = scalar_lea.vmem %s1014_s5, 512  ;;  %s916_s27 = smov [#allocation3]  }
  0x21   : > { %p786_p6 = scmp.ne.s32.totalorder %s1014_s5, %s785_s22  ;;  %s790_s28 = sshll.u32 %s916_s27, 4  ;;  %s791_s28 = int_to_ptr.vmem [resolvable:$false] %s790_s28 }
  0x22   : > { %s792_s29 = scalar_lea.vmem %s791_s28, 1024  ;;  %p793_p12 = scmp.lt.s32.totalorder %s1014_s5, %s791_s28 }
  0x23   : > { %p788_p8 = pnand %p786_p6, %p772_p11  ;;  %p794_p0 = scmp.lt.s32.totalorder %s792_s29, %s785_s22 }
  0x25   : > { %p789_p10 = pneg %p788_p8  ;;  %p795_p1 = por %p794_p0, %p793_p12 }
  0x27   : > { %p796_p2 = pnand %p795_p1, %p789_p10 }
  0x29   : > { %799 = shalt.err (!%p796_p2)
}
  0x2a   : > { %710 = dma.hbm_to_vmem [thread:$0]  (!%p1010_p9), %s1006_s30, 512, %s1014_s5, %s174_s8  }
  0x2b   : > { %s1048_s10 = scalar_lea.hbm %s1221_s1, %s633_s26  ;;  %p623_p13 = scmp.ge.s32.totalorder %s914_s17, 1 }
  0x2c   : > { %p216_p3 = scmp.lt.s32.totalorder %s914_s17, 3  ;;  %s198_s11 = scalar_lea.vmem [#allocation6], %s620_s7 }
  0x2d   : > { %s208_s12 = sshll.u32 %s198_s11, 4  ;;  %s195_s30 = scalar_lea.sflag [#allocation7], %s997_s25  ;;  %s1058_s12 = int_to_ptr.vmem [resolvable:$true] %s208_s12 }
  0x2e   : > { %p1054_p4 = pnand %p623_p13, %p216_p3  ;;  %s800_s5 = scalar_lea.hbm %s1048_s10, 8192 }
  0x2f   : > { %p801_p5 = scmp.ne.s32.totalorder %s1048_s10, %s800_s5  ;;  %s805_s21 = scalar_lea.hbm %s1221_s1, 16384 }
  0x30   : > { %p806_p10 = scmp.lt.u32.totalorder %s1048_s10, %s1221_s1  ;;  %p807_p12 = scmp.lt.u32.totalorder %s805_s21, %s800_s5 }
  0x31   : > { %p803_p6 = pnand %p801_p5, %p772_p11  ;;  %p809_p1 = scmp.lt.u32.totalorder %s800_s5, %s1048_s10 }
  0x32   : > { %p808_p0 = por %p807_p12, %p806_p10 }
  0x33   : > { %p804_p8 = pneg %p803_p6 }
  0x34   : > { %p810_p2 = por %p809_p1, %p808_p0 }
  0x36   : > { %p811_p13 = pnand %p810_p2, %p804_p8 }
  0x38   : > { %814 = shalt.err (!%p811_p13)
}
  0x39   : > { %s815_s27 = scalar_lea.vmem %s1058_s12, 8192  ;;  %s917_s28 = smov [#allocation6]  }
  0x3a   : > { %p816_p3 = scmp.ne.s32.totalorder %s1058_s12, %s815_s27  ;;  %s820_s29 = sshll.u32 %s917_s28, 4  ;;  %s821_s29 = int_to_ptr.vmem [resolvable:$false] %s820_s29 }
  0x3b   : > { %s822_s4 = scalar_lea.vmem %s821_s29, 16384  ;;  %p823_p7 = scmp.lt.s32.totalorder %s1058_s12, %s821_s29 }
  0x3c   : > { %p818_p5 = pnand %p816_p3, %p772_p11  ;;  %p824_p10 = scmp.lt.s32.totalorder %s822_s4, %s815_s27 }
  0x3e   : > { %p819_p6 = pneg %p818_p5  ;;  %p825_p12 = por %p824_p10, %p823_p7 }
  0x40   : > { %p826_p0 = pnand %p825_p12, %p819_p6 }
  0x42   : > { %829 = shalt.err (!%p826_p0)
}
  0x43   : > { %s918_s9 = smov 1024   ;;  %s919_s11 = smov 512  }
  0x44   : > { %s920_s5 = smov 32   ;;  %220 = sbr.rel (%p1054_p4) target bundleno = 409 (0x199), region = 32 }
  0x45   : > { %713 = dma.hbm_to_vmem [thread:$0]  (!%p1010_p9), %s1048_s10, 8192, %s1058_s12, %s195_s30, %s918_s9, %s919_s11, %s920_s5  }
  0x46   : > { %s222_s26 = sand.u32 (!%p1054_p4), 1, %s898_s13   ;;  %p1229_p7 = scmp.ne.s32.totalorder (!%p1054_p4), %s1226_s23, 0 }
  0x47   : > { %s624_s8 = sshll.u32 (!%p1054_p4), %s222_s26, 5  ;;  %s223_s21 = scalar_lea.sflag (!%p1054_p4), [#allocation4], %s222_s26 }
  0x48   : > { %s1089_s22 = scalar_lea.vmem (!%p1054_p4), [#allocation3], %s624_s8 }
  0x4b   : > { %881 = dma.done.wait (%p1229_p7), %s223_s21, 512  }
  0x4c   : > { %883 = vsyncadd (%p1229_p7), %s223_s21, 4294966784  ;;  %s625_s7 = sshll.u32 %s222_s26, 9  ;;  %s232_s6 = scalar_lea.sflag [#allocation7], %s222_s26 }
  0x4d   : > { %s1095_s25 = scalar_lea.vmem [#allocation6], %s625_s7 }
  0x4e   : > { %885 = dma.done.wait (%p1229_p7), %s232_s6, 8192  }
  0x4f   : > { %887 = vsyncadd (%p1229_p7), %s232_s6, 4294959104  ;;  %p626_p9 = scmp.ne.s32.totalorder %s906_s15, 0 }
  0x50   : > { %v921_v0 = vmov (!%p626_p9), 0.0  }
  0x51   : > { %270 = sbr.rel (%p626_p9) target bundleno = 88 (0x58), region = 44  ;;  %271 = vst [vmem:[#allocation2] sm:$0xff] (!%p626_p9), %v921_v0 }
  0x58 PF: > { %v278_v1 = vld [vmem:[%s1095_s25 + $0x8] sm:$0xff]  ;;  %v280_v3 = vld [vmem:[%s1095_s25 + $0x18] sm:$0xff]  ;;  %v277_v6 = vld [vmem:[%s1095_s25] sm:$0xff]  ;;  %p627_p11 = scmp.ne.s32.totalorder %s906_s15, 1 }
  0x59   : > { %v282_v2 = vld [vmem:[%s1095_s25 + $0x28] sm:$0xff]  ;;  %v284_v5 = vld [vmem:[%s1095_s25 + $0x38] sm:$0xff]  ;;  %v281_v7 = vld [vmem:[%s1095_s25 + $0x20] sm:$0xff] }
  0x5a   : > { %v635_v4 = vpack.c.bf16 %v282_v2, %v278_v1  ;;  %v667_v8 = vpack.c.bf16 %v284_v5, %v280_v3  ;;  %v637_v9 = vpack.c.bf16 %v281_v7, %v277_v6  ;;  %v279_v10 = vld [vmem:[%s1095_s25 + $0x10] sm:$0xff]  ;;  %v286_v12 = vld [vmem:[%s1095_s25 + $0x48] sm:$0xff]  ;;  %v288_v15 = vld [vmem:[%s1095_s25 + $0x58] sm:$0xff] }
  0x5b   : > { %v283_v11 = vld [vmem:[%s1095_s25 + $0x30] sm:$0xff]  ;;  %v290_v14 = vld [vmem:[%s1095_s25 + $0x68] sm:$0xff]  ;;  %v292_v16 = vld [vmem:[%s1095_s25 + $0x78] sm:$0xff] }
  0x5c   : > { %636 = vmatprep.subr.bf16.mxu0 %v635_v4  ;;  %v669_v13 = vpack.c.bf16 %v283_v11, %v279_v10  ;;  %668 = vmatprep.subr.bf16.mxu1 %v667_v8  ;;  %v639_v17 = vpack.c.bf16 %v290_v14, %v286_v12  ;;  %v671_v18 = vpack.c.bf16 %v292_v16, %v288_v15  ;;  %v285_v19 = vld [vmem:[%s1095_s25 + $0x40] sm:$0xff]  ;;  %v287_v21 = vld [vmem:[%s1095_s25 + $0x50] sm:$0xff]  ;;  %v294_v23 = vld [vmem:[%s1095_s25 + $0x88] sm:$0xff] }
  0x5d   : > { %638 = vmatpush1.bf16.xpose.msra.mxu0 %v637_v9  ;;  %v289_v20 = vld [vmem:[%s1095_s25 + $0x60] sm:$0xff]  ;;  %v291_v22 = vld [vmem:[%s1095_s25 + $0x70] sm:$0xff]  ;;  %v298_v24 = vld [vmem:[%s1095_s25 + $0xa8] sm:$0xff] }
  0x5e   : > { %670 = vmatpush1.bf16.xpose.msra.mxu1 %v669_v13  ;;  %640 = vmatprep.subr.bf16.mxu0 %v639_v17  ;;  %v296_v25 = vld [vmem:[%s1095_s25 + $0x98] sm:$0xff]  ;;  %v641_v27 = vpack.c.bf16 %v289_v20, %v285_v19  ;;  %v673_v28 = vpack.c.bf16 %v291_v22, %v287_v21  ;;  %v643_v29 = vpack.c.bf16 %v298_v24, %v294_v23  ;;  %v293_v31 = vld [vmem:[%s1095_s25 + $0x80] sm:$0xff]  ;;  %v295_v33 = vld [vmem:[%s1095_s25 + $0x90] sm:$0xff] }
  0x5f   : > { %672 = vmatprep.subr.bf16.mxu1 %v671_v18  ;;  %v300_v26 = vld [vmem:[%s1095_s25 + $0xb8] sm:$0xff]  ;;  %v297_v32 = vld [vmem:[%s1095_s25 + $0xa0] sm:$0xff]  ;;  %v299_v34 = vld [vmem:[%s1095_s25 + $0xb0] sm:$0xff] }
  0x60   : > { %v675_v30 = vpack.c.bf16 %v300_v26, %v296_v25  ;;  %v302_v35 = vld [vmem:[%s1095_s25 + $0xc8] sm:$0xff]  ;;  %v304_v37 = vld [vmem:[%s1095_s25 + $0xd8] sm:$0xff]  ;;  %v645_v39 = vpack.c.bf16 %v297_v32, %v293_v31  ;;  %v677_v40 = vpack.c.bf16 %v299_v34, %v295_v33  ;;  %v301_v43 = vld [vmem:[%s1095_s25 + $0xc0] sm:$0xff] }
  0x61   : > { %v306_v36 = vld [vmem:[%s1095_s25 + $0xe8] sm:$0xff]  ;;  %v308_v38 = vld [vmem:[%s1095_s25 + $0xf8] sm:$0xff]  ;;  %v305_v44 = vld [vmem:[%s1095_s25 + $0xe0] sm:$0xff] }
  0x62   : > { %v647_v41 = vpack.c.bf16 %v306_v36, %v302_v35  ;;  %v679_v42 = vpack.c.bf16 %v308_v38, %v304_v37  ;;  %v303_v45 = vld [vmem:[%s1095_s25 + $0xd0] sm:$0xff]  ;;  %v274_v46 = vld [vmem:[%s1089_s22 + $0x8] sm:$0xff]  ;;  %v276_v47 = vld [vmem:[%s1089_s22 + $0x18] sm:$0xff]  ;;  %v649_v53 = vpack.c.bf16 %v305_v44, %v301_v43 }
  0x63   : > { %v307_v48 = vld [vmem:[%s1095_s25 + $0xf0] sm:$0xff]  ;;  %v310_v49 = vld [vmem:[%s1095_s25 + $0x108] sm:$0xff]  ;;  %405 = vmatprep.mubr.f32.mxu0 %v274_v46  ;;  %v312_v51 = vld [vmem:[%s1095_s25 + $0x118] sm:$0xff]  ;;  %475 = vmatprep.mubr.f32.mxu1 %v276_v47 }
  0x64   : > { %v314_v50 = vld [vmem:[%s1095_s25 + $0x128] sm:$0xff]  ;;  %v316_v52 = vld [vmem:[%s1095_s25 + $0x138] sm:$0xff]  ;;  %v681_v54 = vpack.c.bf16 %v307_v48, %v303_v45  ;;  %v309_v57 = vld [vmem:[%s1095_s25 + $0x100] sm:$0xff] }
  0x65   : > { %642 = vmatpush1.bf16.xpose.msra.mxu0 %v641_v27  ;;  %v651_v55 = vpack.c.bf16 %v314_v50, %v310_v49  ;;  %v683_v56 = vpack.c.bf16 %v316_v52, %v312_v51  ;;  %v313_v58 = vld [vmem:[%s1095_s25 + $0x120] sm:$0xff]  ;;  %v311_v59 = vld [vmem:[%s1095_s25 + $0x110] sm:$0xff]  ;;  %v318_v61 = vld [vmem:[%s1095_s25 + $0x148] sm:$0xff] }
  0x66   : > { %674 = vmatpush1.bf16.xpose.msra.mxu1 %v673_v28  ;;  %644 = vmatprep.subr.bf16.mxu0 %v643_v29  ;;  %v315_v60 = vld [vmem:[%s1095_s25 + $0x130] sm:$0xff]  ;;  %v322_v62 = vld [vmem:[%s1095_s25 + $0x168] sm:$0xff]  ;;  %v320_v63 = vld [vmem:[%s1095_s25 + $0x158] sm:$0xff]  ;;  %v653_v1 = vpack.c.bf16 %v313_v58, %v309_v57 }
  0x67   : > { %676 = vmatprep.subr.bf16.mxu1 %v675_v30  ;;  %v324_v0 = vld [vmem:[%s1095_s25 + $0x178] sm:$0xff]  ;;  %v685_v2 = vpack.c.bf16 %v315_v60, %v311_v59  ;;  %v655_v3 = vpack.c.bf16 %v322_v62, %v318_v61  ;;  %v317_v5 = vld [vmem:[%s1095_s25 + $0x140] sm:$0xff]  ;;  %v319_v7 = vld [vmem:[%s1095_s25 + $0x150] sm:$0xff] }
  0x68   : > { %v687_v4 = vpack.c.bf16 %v324_v0, %v320_v63  ;;  %v321_v6 = vld [vmem:[%s1095_s25 + $0x160] sm:$0xff]  ;;  %v323_v8 = vld [vmem:[%s1095_s25 + $0x170] sm:$0xff]  ;;  %v326_v9 = vld [vmem:[%s1095_s25 + $0x188] sm:$0xff] }
  0x69   : > { %v330_v10 = vld [vmem:[%s1095_s25 + $0x1a8] sm:$0xff]  ;;  %v328_v11 = vld [vmem:[%s1095_s25 + $0x198] sm:$0xff]  ;;  %v657_v13 = vpack.c.bf16 %v321_v6, %v317_v5  ;;  %v689_v14 = vpack.c.bf16 %v323_v8, %v319_v7  ;;  %v325_v17 = vld [vmem:[%s1095_s25 + $0x180] sm:$0xff] }
  0x6a   : > { %v332_v12 = vld [vmem:[%s1095_s25 + $0x1b8] sm:$0xff]  ;;  %v659_v15 = vpack.c.bf16 %v330_v10, %v326_v9  ;;  %v329_v18 = vld [vmem:[%s1095_s25 + $0x1a0] sm:$0xff]  ;;  %v327_v19 = vld [vmem:[%s1095_s25 + $0x190] sm:$0xff] }
  0x6b   : > { %v691_v16 = vpack.c.bf16 %v332_v12, %v328_v11  ;;  %v331_v20 = vld [vmem:[%s1095_s25 + $0x1b0] sm:$0xff]  ;;  %v334_v21 = vld [vmem:[%s1095_s25 + $0x1c8] sm:$0xff]  ;;  %v336_v23 = vld [vmem:[%s1095_s25 + $0x1d8] sm:$0xff]  ;;  %v661_v25 = vpack.c.bf16 %v329_v18, %v325_v17 }
  0x6c   : > { %v338_v22 = vld [vmem:[%s1095_s25 + $0x1e8] sm:$0xff]  ;;  %v340_v24 = vld [vmem:[%s1095_s25 + $0x1f8] sm:$0xff]  ;;  %v693_v26 = vpack.c.bf16 %v331_v20, %v327_v19  ;;  %v333_v29 = vld [vmem:[%s1095_s25 + $0x1c0] sm:$0xff] }
  0x6d   : > { %646 = vmatpush1.bf16.xpose.msra.mxu0 %v645_v39  ;;  %v663_v27 = vpack.c.bf16 %v338_v22, %v334_v21  ;;  %v695_v28 = vpack.c.bf16 %v340_v24, %v336_v23  ;;  %v337_v30 = vld [vmem:[%s1095_s25 + $0x1e0] sm:$0xff]  ;;  %v335_v31 = vld [vmem:[%s1095_s25 + $0x1d0] sm:$0xff]  ;;  %v272_v38 = vld [vmem:[#allocation2] sm:$0xff] }
  0x6e   : > { %678 = vmatpush1.bf16.xpose.msra.mxu1 %v677_v40  ;;  %648 = vmatprep.subr.bf16.mxu0 %v647_v41  ;;  %v339_v32 = vld [vmem:[%s1095_s25 + $0x1f0] sm:$0xff]  ;;  %v665_v33 = vpack.c.bf16 %v337_v30, %v333_v29  ;;  %v273_v35 = vld [vmem:[%s1089_s22] sm:$0xff]  ;;  %v628_v45 = vld [vmem:[%s1222_s2] ss:$0 sm:$0xff] (!%p627_p11) }
  0x6f   : > { %680 = vmatprep.subr.bf16.mxu1 %v679_v42  ;;  %v697_v34 = vpack.c.bf16 %v339_v32, %v335_v31  ;;  %v275_v36 = vld [vmem:[%s1089_s22 + $0x10] sm:$0xff] }
  0x75   : > { %650 = vmatpush1.bf16.xpose.msra.mxu0 %v649_v53 }
  0x76   : > { %682 = vmatpush1.bf16.xpose.msra.mxu1 %v681_v54  ;;  %652 = vmatprep.subr.bf16.mxu0 %v651_v55 }
  0x77   : > { %684 = vmatprep.subr.bf16.mxu1 %v683_v56 }
  0x7d   : > { %654 = vmatpush1.bf16.xpose.msra.mxu0 %v653_v1 }
  0x7e   : > { %686 = vmatpush1.bf16.xpose.msra.mxu1 %v685_v2  ;;  %656 = vmatprep.subr.bf16.mxu0 %v655_v3 }
  0x7f   : > { %688 = vmatprep.subr.bf16.mxu1 %v687_v4 }
  0x85   : > { %658 = vmatpush1.bf16.xpose.msra.mxu0 %v657_v13 }
  0x86   : > { %690 = vmatpush1.bf16.xpose.msra.mxu1 %v689_v14  ;;  %660 = vmatprep.subr.bf16.mxu0 %v659_v15 }
  0x87   : > { %692 = vmatprep.subr.bf16.mxu1 %v691_v16 }
  0x8d   : > { %662 = vmatpush1.bf16.xpose.msra.mxu0 %v661_v25 }
  0x8e   : > { %694 = vmatpush1.bf16.xpose.msra.mxu1 %v693_v26  ;;  %664 = vmatprep.subr.bf16.mxu0 %v663_v27 }
  0x8f   : > { %696 = vmatprep.subr.bf16.mxu1 %v695_v28 }
  0x95   : > { %666 = vmatpush1.bf16.xpose.msra.mxu0 %v665_v33 }
  0x96   : > { %698 = vmatpush1.bf16.xpose.msra.mxu1 %v697_v34 }
  0x9c   : > { %406 = vmatmul.mubr.f32.vlgmr.msra.gmra.mrb[0].mxu0 %v273_v35 }
  0x9d   : > { %476 = vmatmul.mubr.f32.vlgmr.msra.gmra.mrb[0].mxu1 %v275_v36 }
 0x16f   : > { %v407_v37 = vpop.f32.mrb[0].mxu0  ;;  %486 = sbr.rel (%p627_p11) target bundleno = 384 (0x180), region = 48 }
 0x170   : > { %v477_v39 = vpop.f32.mrb[0].mxu1  ;;  %v409_v40 = vpop.f32.mrb[1].mxu0 }
 0x171   : > { %v478_v41 = vadd.f32 %v477_v39, %v407_v37  ;;  %v479_v42 = vpop.f32.mrb[1].mxu1 }
 0x173   : > { %v481_v43 = vadd.f32 %v478_v41, %v272_v38 }
 0x175   : > { %482 = vst [vmem:[#allocation2] sm:$0xff] %v481_v43 }
 0x17c   : > { %v487_v44 = vld [vmem:[#allocation2] sm:$0xff] }
 0x17d   : > { %v495_v46 = vadd.f32 %v628_v45, %v487_v44 }
 0x17f   : > { %496 = vst [vmem:[#allocation8] sm:$0xff] %v495_v46 }
 0x180 PF: > { %p1176_p4 = scmp.eq.s32.totalorder %s613_s18, 1  ;;  %s922_s20 = smov [#allocation8]  }
 0x181   : > { %s507_s30 = sshll.u32 %s922_s20, 4  ;;  %s508_s30 = int_to_ptr.vmem [resolvable:$true] %s507_s30 }
 0x182   : > { %s830_s15 = scalar_lea.vmem %s508_s30, 128  ;;  %p837_p13 = scmp.lt.s32.totalorder %s508_s30, %s508_s30 }
 0x183   : > { %p831_p8 = scmp.ne.s32.totalorder %s508_s30, %s830_s15  ;;  %p838_p3 = scmp.lt.s32.totalorder %s830_s15, %s830_s15 }
 0x185   : > { %p832_p1 = pnand %p831_p8, %p1176_p4  ;;  %p839_p5 = por %p838_p3, %p837_p13 }
 0x187   : > { %p833_p2 = pneg %p832_p1 }
 0x189   : > { %p840_p6 = pnand %p839_p5, %p833_p2 }
 0x18b   : > { %843 = shalt.err (!%p840_p6)
}
 0x18c   : > { %s844_s18 = scalar_lea.hbm %s1223_s3, 128 }
 0x18d   : > { %p845_p10 = scmp.ne.s32.totalorder %s1223_s3, %s844_s18  ;;  %p850_p7 = scmp.lt.u32.totalorder %s844_s18, %s1223_s3 }
 0x18f   : > { %p846_p12 = pnand %p845_p10, %p1176_p4 }
 0x191   : > { %p847_p0 = pneg %p846_p12 }
 0x193   : > { %p852_p9 = pnand %p850_p7, %p847_p0 }
 0x195   : > { %855 = shalt.err (!%p852_p9)
}
 0x196   : > { %704 = dma.vmem_to_hbm [thread:$0]  (%p1176_p4), %s508_s30, 128, %s1223_s3, [#allocation5]  }
 0x197   : > { %889 = dma.done.wait (%p1176_p4), [#allocation5], 128  }
 0x198   : > { %891 = vsyncadd (%p1176_p4), [#allocation5], 4294967168 }
 0x199 PF: > { %s20_s17 = sadd.s32 1, %s914_s17   ;;  %s1231_s12 = smov %s898_s13 }
 0x19a   : > { %p17_p11 = scmp.ge.s32.totalorder %s20_s17, 4   ;;  %s1232_s13 = smov %s902_s14 }
 0x19b   : > { %s1233_s14 = smov %s994_s24  ;;  %s1234_s15 = smov %s910_s16 }
 0x19c   : > { %s1235_s16 = smov %s1237_s19  ;;  %19 = sbr.rel (!%p17_p11) target bundleno = 7 (0x7), region = 94 }
 0x1a3   :  { %520 = vsyncpa [#allocation4], 1 }
 0x1a4   :  { %522 = vsyncpa [#allocation4 + $0x1], 1 }
 0x1a5   :  { %523 = vsyncpa [#allocation7], 1 }
 0x1a6   :  { %525 = vsyncpa [#allocation7 + $0x1], 1 }
 0x1a7   :  { %526 = vsyncpa [#allocation5], 1 }
 0x1a8   :  { %528 = vsyncpa [#allocation5 + $0x1], 1 }

</bundles_post_ra>
